<compile_context>
chip_gen: v7x
topology: tpu7x:2x2x1
jax: 0.10.0
libtpu: 0.0.40
codegen_flags: <defaults>
</compile_context>

<pallas_src>
import functools
import math

import jax
import jax.numpy as jnp
from jax import lax
from jax.experimental import pallas as pl
from jax.experimental.pallas import tpu as pltpu


# 48 MiB scoped VMEM: leaves headroom on v7x (64 MiB physical) and is well under
# the 128 MiB of v5e/v6e.  Tile caps below keep the worst-case usage ~< 10 MiB.
_VMEM_LIMIT = 48 * 1024 * 1024


# ---------------------------------------------------------------------------
# Positional encoding buffer ("Attention Is All You Need" sin/cos table).
# Computed once in the wrapper (constant buffer in the torch module); the add
# to x is fused into the QKV projection kernel.
# ---------------------------------------------------------------------------
def positional_encoding(length, d_model, dtype=jnp.float32):
    position = jnp.arange(length, dtype=jnp.float32)[:, None]
    div_term = jnp.exp(
        jnp.arange(0, d_model, 2, dtype=jnp.float32) * (-math.log(10000.0) / d_model)
    )
    angles = position * div_term                      # (L, d_model//2)
    pe = jnp.zeros((length, d_model), dtype=jnp.float32)
    pe = pe.at[:, 0::2].set(jnp.sin(angles))
    pe = pe.at[:, 1::2].set(jnp.cos(angles))
    return pe.astype(dtype)


def _pick_tile(n, cap):
    """Largest tile that divides n, is <= cap, and is a multiple of 128 (or n itself)."""
    if n <= cap:
        return n
    t = (cap // 128) * 128
    while t >= 128:
        if n % t == 0:
            return t
        t -= 128
    # TODO(synk): non-128-divisible n falls back to one full-length tile; for very
    # long sequences pad L upstream instead (a giant tile can exceed VMEM on v7x).
    return n


# ---------------------------------------------------------------------------
# Kernel 1: fused positional-encoding add + QKV projection (x + pe) @ W.
# Output layout is de-interleaved (B, 3, L, E) bf16; the innermost grid axis is
# the q/k/v chunk so the (x + pe) tile is fetched once and reused for all three.
# ---------------------------------------------------------------------------
def _qkv_kernel(x_ref, pe_ref, w_ref, o_ref):
    # x_ref: (1, TL, D) f32, pe_ref: (TL, D) f32, w_ref: (D, E) bf16,
    # o_ref: (1, 1, TL, E) bf16
    x = (x_ref[0] + pe_ref[...]).astype(jnp.bfloat16)
    o_ref[0, 0] = jnp.dot(
        x, w_ref[...], preferred_element_type=jnp.float32
    ).astype(o_ref.dtype)


def _qkv_proj(x, pe, w_bf16, *, e, tl):
    B, L, D = x.shape
    grid = (B, L // tl, 3)
    flops = 2 * B * L * D * 3 * e
    bytes_accessed = int(
        x.size * x.dtype.itemsize
        + pe.size * pe.dtype.itemsize
        + 3 * w_bf16.size * 2
        + B * 3 * L * e * 2
    )
    return pl.pallas_call(
        _qkv_kernel,
        out_shape=jax.ShapeDtypeStruct((B, 3, L, e), jnp.bfloat16),
        grid_spec=pltpu.PrefetchScalarGridSpec(
            num_scalar_prefetch=0,
            grid=grid,
            in_specs=[
                pl.BlockSpec((1, tl, D), lambda b, i, c: (b, i, 0)),
                pl.BlockSpec((tl, D), lambda b, i, c: (i, 0)),
                pl.BlockSpec((D, e), lambda b, i, c: (0, c)),
            ],
            out_specs=pl.BlockSpec((1, 1, tl, e), lambda b, i, c: (b, c, i, 0)),
        ),
        compiler_params=pltpu.CompilerParams(
            dimension_semantics=("parallel", "parallel", "parallel"),
            vmem_limit_bytes=_VMEM_LIMIT,
        ),
        cost_estimate=pl.CostEstimate(
            flops=int(flops), transcendentals=0, bytes_accessed=bytes_accessed
        ),
    )(x, pe, w_bf16)


# ---------------------------------------------------------------------------
# Kernel 2: flash-attention forward (online softmax), no mask, no dropout.
# q/k/v are the three planes of the (B, 3, L, E) bf16 qkv tensor; q is already
# pre-scaled (scale folded into the weight), so the inner loop is only:
#   MXU: q@k^T, p@v (bf16 in, f32 acc)   EUP: exp   VPU: max/rescale adds.
# ---------------------------------------------------------------------------
def _flash_kernel(q_ref, k_ref, v_ref, o_ref, m_sc, l_sc, acc_sc):
    ki = pl.program_id(2)

    @pl.when(ki == 0)
    def _():
        m_sc[...] = jnp.full(m_sc.shape, -jnp.inf, dtype=m_sc.dtype)
        l_sc[...] = jnp.zeros(l_sc.shape, dtype=l_sc.dtype)
        acc_sc[...] = jnp.zeros(acc_sc.shape, dtype=acc_sc.dtype)

    q = q_ref[0, 0]                                    # (TQ, E) bf16, pre-scaled
    k = k_ref[0, 0]                                    # (TK, E) bf16
    # s = q @ k^T  (contract last dims on the MXU, f32 accumulate)
    s = lax.dot_general(
        q, k, (((1,), (1,)), ((), ())), preferred_element_type=jnp.float32
    )                                                  # (TQ, TK) f32

    m_prev = m_sc[...]                                 # (TQ, 1)
    m_new = jnp.maximum(m_prev, s.max(axis=-1, keepdims=True))
    alpha = jnp.exp(m_prev - m_new)
    p = jnp.exp(s - m_new)                             # (TQ, TK) f32
    l_sc[...] = alpha * l_sc[...] + p.sum(axis=-1, keepdims=True)
    acc_sc[...] = alpha * acc_sc[...] + jnp.dot(
        p.astype(jnp.bfloat16), v_ref[0, 0], preferred_element_type=jnp.float32
    )
    m_sc[...] = m_new

    @pl.when(ki == pl.num_programs(2) - 1)
    def _():
        o_ref[0] = (
            acc_sc[...] * pl.reciprocal(l_sc[...], approx=True)
        ).astype(o_ref.dtype)


def _flash_attention(qkv, *, e, tq, tk, out_dtype):
    B, _, L, _ = qkv.shape
    grid = (B, L // tq, L // tk)
    kv_rereads = L // tq
    flops = 4 * B * L * L * e
    transcendentals = B * L * L
    bytes_accessed = int(
        B * L * e * 2                        # q (bf16), read once
        + 2 * B * L * e * 2 * kv_rereads     # k and v (bf16), re-read per q tile
        + B * L * e * jnp.dtype(out_dtype).itemsize
    )
    return pl.pallas_call(
        _flash_kernel,
        out_shape=jax.ShapeDtypeStruct((B, L, e), out_dtype),
        grid_spec=pltpu.PrefetchScalarGridSpec(
            num_scalar_prefetch=0,
            grid=grid,
            in_specs=[
                # q / k / v planes selected via the 2nd block index of (B, 3, L, E):
                # each DMA is a contiguous (tile, E) slab.
                pl.BlockSpec((1, 1, tq, e), lambda b, qi, ki: (b, 0, qi, 0)),
                pl.BlockSpec((1, 1, tk, e), lambda b, qi, ki: (b, 1, ki, 0)),
                pl.BlockSpec((1, 1, tk, e), lambda b, qi, ki: (b, 2, ki, 0)),
            ],
            out_specs=pl.BlockSpec((1, tq, e), lambda b, qi, ki: (b, qi, 0)),
            scratch_shapes=[
                pltpu.VMEM((tq, 1), jnp.float32),      # running max m
                pltpu.VMEM((tq, 1), jnp.float32),      # running denom l
                pltpu.VMEM((tq, e), jnp.float32),      # output accumulator
            ],
        ),
        compiler_params=pltpu.CompilerParams(
            dimension_semantics=("parallel", "parallel", "arbitrary"),
            vmem_limit_bytes=_VMEM_LIMIT,
        ),
        cost_estimate=pl.CostEstimate(
            flops=int(flops),
            transcendentals=int(transcendentals),
            bytes_accessed=bytes_accessed,
        ),
    )(qkv, qkv, qkv)


# ---------------------------------------------------------------------------
# Wrapper matching Attention1.forward(x) (context/mask unused, dropout=0.0).
# ---------------------------------------------------------------------------
def attention1_forward(x, w_qkv, *, q_tile_cap=1024, kv_tile_cap=512, proj_tile_cap=512):
    """x: (B, L, dim); w_qkv: (dim, 3*inner_dim) == torch Linear weight transposed."""
    B, L, D = x.shape
    N3 = w_qkv.shape[1]
    assert N3 % 3 == 0, "W_qkv must produce 3 * inner_dim features"
    E = N3 // 3
    assert E % 128 == 0, "inner_dim (= heads * dim_head) must be a multiple of 128"

    pe = positional_encoding(L, D, x.dtype)

    # Fold SDPA's default softmax scale 1/sqrt(inner_dim) into the q columns of the
    # weight, then cast the weight to bf16 once (halves weight DMA, zero in-loop cost).
    scale = 1.0 / math.sqrt(E)
    w_bf16 = w_qkv.astype(jnp.float32).at[:, :E].multiply(scale).astype(jnp.bfloat16)

    tl = _pick_tile(L, proj_tile_cap)
    qkv = _qkv_proj(x, pe, w_bf16, e=E, tl=tl)         # (B, 3, L, E) bf16

    tq = _pick_tile(L, q_tile_cap)                     # large: cuts K/V HBM re-reads
    tk = _pick_tile(L, kv_tile_cap)                    # moderate: bounds (tq, tk) temps
    return _flash_attention(qkv, e=E, tq=tq, tk=tk, out_dtype=x.dtype)


# ---------------------------------------------------------------------------
# Pure-JAX references.
# ---------------------------------------------------------------------------
def attention1_reference(x, w_qkv, matmul_dtype=None):
    """matmul_dtype=None: exact f32 module semantics.
    matmul_dtype=bf16: mimic the kernel's bf16 matmul-input roundings (tight check)."""
    B, L, D = x.shape
    pe = positional_encoding(L, D, jnp.float32)
    h = x.astype(jnp.float32) + pe[None]
    w = w_qkv.astype(jnp.float32)
    E = w.shape[1] // 3
    scale = 1.0 / math.sqrt(E)
    if matmul_dtype is None:
        qkv = h @ w
        q, k, v = jnp.split(qkv, 3, axis=-1)
        s = jnp.einsum("bqd,bkd->bqk", q, k) * scale
        p = jax.nn.softmax(s, axis=-1)
        return jnp.einsum("bqk,bkd->bqd", p, v)
    w = w.at[:, :E].multiply(scale).astype(matmul_dtype)
    h = h.astype(matmul_dtype)
    qkv = jnp.einsum("bld,de->ble", h, w, preferred_element_type=jnp.float32)
    qkv = qkv.astype(matmul_dtype)
    q, k, v = jnp.split(qkv, 3, axis=-1)
    s = jnp.einsum("bqd,bkd->bqk", q, k, preferred_element_type=jnp.float32)
    p = jax.nn.softmax(s, axis=-1)
    return jnp.einsum(
        "bqk,bkd->bqd", p.astype(matmul_dtype), v, preferred_element_type=jnp.float32
    )


if __name__ == "__main__":
    key = jax.random.PRNGKey(0)
    # Small Attention1 config: dim=64, heads=4, dim_head=32 -> inner_dim = 128.
    B, L, dim = 2, 128, 64
    heads, dim_head = 4, 32
    inner_dim = heads * dim_head

    kx, kw = jax.random.split(key)
    x = jax.random.normal(kx, (B, L, dim), dtype=jnp.float32)
    # torch nn.Linear(dim, 3*inner_dim, bias=False).weight has shape (3*inner, dim);
    # we hold its transpose (dim, 3*inner) so kernels compute x @ W directly.
    w_qkv = jax.random.normal(kw, (dim, 3 * inner_dim), dtype=jnp.float32) * (
        1.0 / math.sqrt(dim)
    )

    y = jax.block_until_ready(attention1_forward(x, w_qkv))
    assert y.shape == (B, L, inner_dim), y.shape

    # Tight check vs. a reference with matching bf16 matmul-input roundings.
    y_ref_bf16 = attention1_reference(x, w_qkv, matmul_dtype=jnp.bfloat16)
    err_bf16 = float(jnp.max(jnp.abs(y - y_ref_bf16)))
    assert jnp.allclose(y, y_ref_bf16, atol=1e-2, rtol=1e-2), (
        f"mismatch vs bf16-matched reference: {err_bf16}"
    )

    # Loose sanity check vs. the exact f32 module semantics (bf16 MXU inputs).
    y_ref_f32 = attention1_reference(x, w_qkv)
    err_f32 = float(jnp.max(jnp.abs(y - y_ref_f32)))
    assert jnp.allclose(y, y_ref_f32, atol=5e-2, rtol=5e-2), (
        f"mismatch vs f32 reference: {err_f32}"
    )

    print("KERNEL_OK")
</pallas_src>

<mosaic_0001>
module attributes {stable_mosaic.version = 11 : i64} {
  func.func @_qkv_kernel(%arg0: i32, %arg1: i32, %arg2: i32, %arg3: memref<1x128x64xf32, #tpu.memory_space<vmem>>, %arg4: memref<128x64xf32, #tpu.memory_space<vmem>>, %arg5: memref<64x128xbf16, #tpu.memory_space<vmem>>, %arg6: memref<1x1x128x128xbf16, #tpu.memory_space<vmem>>) attributes {dimension_semantics = [#tpu.dimension_semantics<parallel>, #tpu.dimension_semantics<parallel>, #tpu.dimension_semantics<parallel>], iteration_bounds = array<i64: 2, 1, 3>, scalar_prefetch = 0 : i64, scratch_operands = 0 : i64, tpu.core_type = #tpu.core_type<tc>, window_params = [{transform_indices = @transform_0, window_bounds = array<i64: 1, 128, 64>}, {transform_indices = @transform_1, window_bounds = array<i64: 128, 64>}, {transform_indices = @transform_2, window_bounds = array<i64: 64, 128>}, {transform_indices = @transform_3, window_bounds = array<i64: 1, 1, 128, 128>}]} {
    %c0 = arith.constant 0 : index
    %c0_0 = arith.constant 0 : index
    %c0_1 = arith.constant 0 : index
    %0 = vector.load %arg3[%c0, %c0_0, %c0_1] : memref<1x128x64xf32, #tpu.memory_space<vmem>>, vector<1x128x64xf32>
    %1 = vector.shape_cast %0 : vector<1x128x64xf32> to vector<128x64xf32>
    %c0_2 = arith.constant 0 : index
    %c0_3 = arith.constant 0 : index
    %2 = vector.load %arg4[%c0_2, %c0_3] : memref<128x64xf32, #tpu.memory_space<vmem>>, vector<128x64xf32>
    %3 = arith.addf %1, %2 : vector<128x64xf32>
    %4 = arith.truncf %3 : vector<128x64xf32> to vector<128x64xbf16>
    %c0_4 = arith.constant 0 : index
    %c0_5 = arith.constant 0 : index
    %5 = vector.load %arg5[%c0_4, %c0_5] : memref<64x128xbf16, #tpu.memory_space<vmem>>, vector<64x128xbf16>
    %cst = arith.constant dense<0.000000e+00> : vector<128x128xf32>
    %6 = tpu.matmul %4, %5, %cst {dimension_numbers = #tpu.dot_dimension_numbers<[1], [0], [0], [1], [0, 0, 1, 1], [], []>} : vector<128x64xbf16>, vector<64x128xbf16>, vector<128x128xf32> -> vector<128x128xf32>
    %7 = arith.truncf %6 : vector<128x128xf32> to vector<128x128xbf16>
    %c0_6 = arith.constant 0 : index
    %c0_7 = arith.constant 0 : index
    %c0_8 = arith.constant 0 : index
    %c0_9 = arith.constant 0 : index
    %8 = vector.load %arg6[%c0_6, %c0_7, %c0_8, %c0_9] : memref<1x1x128x128xbf16, #tpu.memory_space<vmem>>, vector<1x1x128x128xbf16>
    %9 = vector.shape_cast %8 : vector<1x1x128x128xbf16> to vector<128x128xbf16>
    %10 = vector.shape_cast %7 : vector<128x128xbf16> to vector<1x1x128x128xbf16>
    tpu.vector_store %arg6[%c0_6, %c0_7, %c0_8, %c0_9], %10 {strides = array<i32>} : memref<1x1x128x128xbf16, #tpu.memory_space<vmem>>, vector<1x1x128x128xbf16>,
    return
  }
  func.func @transform_0(%arg0: i32, %arg1: i32, %arg2: i32) -> (i32, i32, i32) {
    %c0_i32 = arith.constant 0 : i32
    %c0_i32_0 = arith.constant 0 : i32
    return %arg0, %arg1, %c0_i32 : i32, i32, i32
  }
  func.func @transform_1(%arg0: i32, %arg1: i32, %arg2: i32) -> (i32, i32) {
    %c0_i32 = arith.constant 0 : i32
    %c0_i32_0 = arith.constant 0 : i32
    return %arg1, %c0_i32 : i32, i32
  }
  func.func @transform_2(%arg0: i32, %arg1: i32, %arg2: i32) -> (i32, i32) {
    %c0_i32 = arith.constant 0 : i32
    %c0_i32_0 = arith.constant 0 : i32
    return %c0_i32, %arg2 : i32, i32
  }
  func.func @transform_3(%arg0: i32, %arg1: i32, %arg2: i32) -> (i32, i32, i32, i32) {
    %c0_i32 = arith.constant 0 : i32
    %c0_i32_0 = arith.constant 0 : i32
    return %arg0, %arg2, %arg1, %c0_i32 : i32, i32, i32, i32
  }
}

</mosaic_0001>

<bundles_post_ra>
// kernel: tpu_custom_call.1
= control target key start
LH: loop header
LB: loop body
LE: loop exit
PB: predicated region body
PF: predicated region fallthrough
CT: control target
= control target key end

     0   :  { %8 = vsyncpa [#allocation4], 0  ;;  %s1389_s0 = inlined_call_operand.vmem [shape: f32[2,128,64], index: 0, kind: input, shape index: {}]   ;;  %s1390_s1 = inlined_call_operand.vmem [shape: f32[128,64], index: 1, kind: input, shape index: {}]   ;;  %s1391_s2 = inlined_call_operand.vmem [shape: bf16[64,384], index: 2, kind: input, shape index: {}]   ;;  %s1392_s3 = inlined_call_operand.hbm [shape: bf16[2,3,128,128], index: 3, kind: output, shape index: {}]  }
   0x1   :  { %10 = vsyncpa [#allocation4 + $0x1], 0  ;;  %s1131_s12 = smov 0   ;;  %s1133_s13 = smov 0  }
   0x2   :  { %s1135_s14 = smov 0   ;;  %s1137_s15 = smov 0  }
   0x3   :  { %s1139_s16 = smov 0   ;;  %s1141_s17 = smov 0  }
   0x4   :  { %s1143_s18 = smov 0   ;;  %s1145_s19 = smov 0  }
   0x5   :  { %s1147_s20 = smov 0   ;;  %s1149_s21 = smov 0  }
   0x6 LB: > { %s749_s22 = sadd.s32 4294967295, %s1106_s21   ;;  %s750_s23 = sadd.s32 4294967294, %s1106_s21   ;;  %s1106_s21 = sphi %s1149_s21, %s16_s21   ;;  %s1102_s20 = sphi %s1147_s20, %s1404_s20   ;;  %s1098_s19 = sphi %s1145_s19, %s1403_s19   ;;  %s1094_s18 = sphi %s1143_s18, %s1402_s18   ;;  %s1090_s17 = sphi %s1141_s17, %s1401_s17   ;;  %s1086_s16 = sphi %s1139_s16, %s1400_s16   ;;  %s1082_s15 = sphi %s1137_s15, %s1399_s15   ;;  %s1078_s14 = sphi %s1135_s14, %s1398_s14   ;;  %s1074_s13 = sphi %s1133_s13, %s1397_s13   ;;  %s1070_s12 = sphi %s1131_s12, %s1396_s12  }
   0x7   : > { %s28_s24 = sadd.s32 1, %s1098_s19  ;;  %s35_s25 = sadd.s32 1, %s1102_s20 }
   0x8   : > { %p29_p0 = scmp.ge.s32.totalorder %s28_s24, 3  ;;  %s96_s26 = sadd.s32 1, %s1086_s16 }
   0x9   : > { %p103_p1 = scmp.ne.s32.totalorder %s1086_s16, %s1082_s15  ;;  %p104_p2 = scmp.eq.s32.totalorder %s1106_s21, 0 }
   0xa   : > { %s1406_s24 = smov (%p29_p0, %s28_s24), 0  ;;  %s1408_s25 = smov (!%p29_p0, %s35_s25), %s1102_s20 }
   0xb   : > { %s93_s27 = ssub.s32 %s1098_s19, %s1406_s24  ;;  %p1194_p3 = por %p104_p2, %p103_p1 }
   0xc   : > { %p37_p4 = scmp.ge.s32.totalorder %s1408_s25, 2  ;;  %p94_p5 = scmp.eq.s32.totalorder %s93_s27, 0 }
   0xd   : > { %s126_s29 = sadd.s32 1, %s1078_s14  ;;  %p136_p6 = scmp.ne.s32.totalorder %s1078_s14, %s1074_s13 }
   0xe   : > { %s1410_s25 = smov (%p37_p4, %s1408_s25), 0  ;;  %p137_p7 = scmp.eq.s32.totalorder %s749_s22, 5 }
   0xf   : > { %s1204_s30 = scalar_select %p94_p5, %s1086_s16, %s96_s26  }
  0x10   : > { %s119_s4 = ssub.s32 %s1102_s20, %s1410_s25  ;;  %p142_p8 = scmp.ne.s32.totalorder %s1074_s13, %s1070_s12 }
  0x11   : > { %s121_s5 = sor.u32 %s119_s4, %s93_s27  ;;  %p1210_p10 = por %p137_p7, %p136_p6 }
  0x12   : > { %p124_p9 = scmp.eq.s32.totalorder %s121_s5, 0  ;;  %p143_p11 = scmp.eq.s32.totalorder %s750_s23, 5 }
  0x13   : > { %p753_p13 = scmp.ge.s32.totalorder %s1106_s21, 6 }
  0x14   : > { %s1215_s7 = scalar_select %p124_p9, %s1078_s14, %s126_s29  }
  0x15   : > { %p1217_p12 = por %p143_p11, %p142_p8  ;;  %168 = sbr.rel (%p753_p13) target bundleno = 37 (0x25), region = 20 }
  0x1c   : > { %184 = sbr.rel (!%p1194_p3) target bundleno = 37 (0x25), region = 28  ;;  %s186_s9 = sand.u32 (%p1194_p3), 1, %s1086_s16  }
  0x1d   : > { %s755_s10 = sshll.u32 (%p1194_p3), %s1098_s19, 2  ;;  %s754_s11 = sshll.u32 (%p1194_p3), %s186_s9, 5 }
  0x1e   : > { %s190_s23 = scalar_lea.vmem (%p1194_p3), %s1391_s2, %s755_s10  ;;  %s188_s27 = scalar_lea.vmem (%p1194_p3), [#allocation2], %s754_s11 }
  0x1f   : > { %v206_v0 = vld [vmem:[%s190_s23] sm:$0xf] (%p1194_p3)  ;;  %v208_v1 = vld [vmem:[%s190_s23 + $0xc] sm:$0xf] (%p1194_p3)  ;;  %v210_v2 = vld [vmem:[%s190_s23 + $0x18] sm:$0xf] (%p1194_p3) }
  0x20   : > { %207 = vst [vmem:[%s188_s27] sm:$0xf] (%p1194_p3), %v206_v0  ;;  %209 = vst [vmem:[%s188_s27 + $0x4] sm:$0xf] (%p1194_p3), %v208_v1  ;;  %v212_v3 = vld [vmem:[%s190_s23 + $0x24] sm:$0xf] (%p1194_p3) }
  0x21   : > { %v214_v4 = vld [vmem:[%s190_s23 + $0x30] sm:$0xf] (%p1194_p3)  ;;  %211 = vst [vmem:[%s188_s27 + $0x8] sm:$0xf] (%p1194_p3), %v210_v2  ;;  %213 = vst [vmem:[%s188_s27 + $0xc] sm:$0xf] (%p1194_p3), %v212_v3 }
  0x22   : > { %215 = vst [vmem:[%s188_s27 + $0x10] sm:$0xf] (%p1194_p3), %v214_v4  ;;  %v216_v5 = vld [vmem:[%s190_s23 + $0x3c] sm:$0xf] (%p1194_p3)  ;;  %v218_v6 = vld [vmem:[%s190_s23 + $0x48] sm:$0xf] (%p1194_p3) }
  0x23   : > { %v220_v7 = vld [vmem:[%s190_s23 + $0x54] sm:$0xf]  ;;  %217 = vst [vmem:[%s188_s27 + $0x14] sm:$0xf] %v216_v5  ;;  %219 = vst [vmem:[%s188_s27 + $0x18] sm:$0xf] %v218_v6 }
  0x24   : > { %221 = vst [vmem:[%s188_s27 + $0x1c] sm:$0xf] %v220_v7 }
  0x25 PF: > { %p756_p0 = scmp.ge.s32.totalorder %s1106_s21, 1  ;;  %p259_p1 = scmp.lt.s32.totalorder %s1106_s21, 7 }
  0x27   : > { %p260_p2 = pnand %p756_p0, %p259_p1 }
  0x28   : > { %s266_s28 = sand.u32 (!%p260_p2), 1, %s1082_s15   ;;  %p304_p3 = scmp.lt.s32.totalorder (!%p260_p2), %s1094_s18, 1  ;;  %v337_v9 = vld [vmem:[%s1390_s1] sm:$0xff] (!%p260_p2)  ;;  %v338_v10 = vld [vmem:[%s1390_s1 + $0x8] sm:$0xff] (!%p260_p2)  ;;  %v339_v18 = vld [vmem:[%s1390_s1 + $0x10] sm:$0xff] (!%p260_p2)  ;;  %vm409_vm0 = vcmask (!%p260_p2), 523264  }
  0x29   : > { %263 = sbr.rel (%p260_p2) target bundleno = 301 (0x12d), region = 69  ;;  %s757_s29 = sshll.u32 (!%p260_p2), %s266_s28, 5  ;;  %v345_v11 = vld [vmem:[%s1390_s1 + $0x40] sm:$0xff] (!%p260_p2)  ;;  %v346_v13 = vld [vmem:[%s1390_s1 + $0x48] sm:$0xff] (!%p260_p2)  ;;  %v340_v25 = vld [vmem:[%s1390_s1 + $0x18] sm:$0xff] (!%p260_p2) }
  0x2a   : > { %s1233_s4 = scalar_lea.vmem (!%p260_p2), [#allocation2], %s757_s29  ;;  %v347_v26 = vld [vmem:[%s1390_s1 + $0x50] sm:$0xff] (!%p260_p2)  ;;  %v348_v27 = vld [vmem:[%s1390_s1 + $0x58] sm:$0xff] (!%p260_p2)  ;;  %v341_v28 = vld [vmem:[%s1390_s1 + $0x20] sm:$0xff] (!%p260_p2)  ;;  %s902_s26 = smul.u32 (!%p260_p2), 48, %s1094_s18 }
  0x2b   : > { %v992_v8 = vld [vmem:[%s1233_s4] sm:$0xff] (!%p260_p2)   ;;  %v993_v12 = vld [vmem:[%s1233_s4 + $0x8] sm:$0xff] (!%p260_p2)   ;;  %v994_v14 = vld [vmem:[%s1233_s4 + $0x10] sm:$0xff] (!%p260_p2)   ;;  %s790_s23 = sshll.u32 (!%p260_p2), %s1090_s17, 4  ;;  %s1108_s22 = smov (!%p260_p2), [#allocation3]  }
  0x2c   : > { %870 = vmatprep.subr.bf16.mxu0 (!%p260_p2), %v992_v8  ;;  %894 = vmatprep.subr.bf16.mxu1 (!%p260_p2), %v992_v8  ;;  %v995_v29 = vld [vmem:[%s1233_s4 + $0x18] sm:$0xff] (!%p260_p2)   ;;  %v342_v36 = vld [vmem:[%s1390_s1 + $0x28] sm:$0xff] (!%p260_p2)  ;;  %v349_v40 = vld [vmem:[%s1390_s1 + $0x60] sm:$0xff] (!%p260_p2)  ;;  %s626_s27 = sadd.s32 (!%p260_p2), %s902_s26, %s790_s23 }
  0x2d   : > { %871 = vmatpush3.bf16.msra.mxu0 (!%p260_p2), %v992_v8  ;;  %898 = vmatpush3.bf16.msra.mxu1 (!%p260_p2), %v992_v8  ;;  %v350_v41 = vld [vmem:[%s1390_s1 + $0x68] sm:$0xff] (!%p260_p2)  ;;  %v343_v54 = vld [vmem:[%s1390_s1 + $0x30] sm:$0xff] (!%p260_p2)  ;;  %v344_v55 = vld [vmem:[%s1390_s1 + $0x38] sm:$0xff] (!%p260_p2)  ;;  %s791_s28 = sshll.u32 (!%p260_p2), %s626_s27, 6 }
  0x2e   : > { %872 = vmatprep.subr.bf16.mxu0 (!%p260_p2), %v993_v12  ;;  %895 = vmatprep.subr.bf16.mxu1 (!%p260_p2), %v993_v12  ;;  %v351_v60 = vld [vmem:[%s1390_s1 + $0x70] sm:$0xff] (!%p260_p2)  ;;  %v352_v61 = vld [vmem:[%s1390_s1 + $0x78] sm:$0xff] (!%p260_p2)  ;;  %s1325_s9 = scalar_lea.hbm (!%p260_p2), %s1392_s3, %s791_s28 }
  0x30   : > { %s305_s5 = scalar_select %p304_p3, %s1094_s18, 1 }
  0x31   : > { %873 = vmatpush3.bf16.msra.mxu0 %v993_v12  ;;  %899 = vmatpush3.bf16.msra.mxu1 %v993_v12 }
  0x32   : > { %s794_s15 = sshll.u32 %s305_s5, 7  ;;  %874 = vmatprep.subr.bf16.mxu0 %v994_v14  ;;  %896 = vmatprep.subr.bf16.mxu1 %v994_v14 }
  0x33   : > { %s1254_s10 = scalar_lea.vmem %s1389_s0, %s794_s15 }
  0x34   : > { %v321_v15 = vld [vmem:[%s1254_s10] sm:$0xff]  ;;  %v322_v16 = vld [vmem:[%s1254_s10 + $0x8] sm:$0xff]  ;;  %v323_v23 = vld [vmem:[%s1254_s10 + $0x10] sm:$0xff] }
  0x35   : > { %v329_v17 = vld [vmem:[%s1254_s10 + $0x40] sm:$0xff]  ;;  %v353_v19 = vadd.f32 %v337_v9, %v321_v15  ;;  %v354_v20 = vadd.f32 %v338_v10, %v322_v16  ;;  %v330_v21 = vld [vmem:[%s1254_s10 + $0x48] sm:$0xff]  ;;  %v324_v24 = vld [vmem:[%s1254_s10 + $0x18] sm:$0xff]  ;;  %v355_v42 = vadd.f32 %v339_v18, %v323_v23  ;;  %875 = vmatpush3.bf16.msra.mxu0 %v994_v14  ;;  %900 = vmatpush3.bf16.msra.mxu1 %v994_v14 }
  0x36   : > { %v361_v22 = vadd.f32 %v345_v11, %v329_v17  ;;  %v362_v30 = vadd.f32 %v346_v13, %v330_v21  ;;  %v331_v31 = vld [vmem:[%s1254_s10 + $0x50] sm:$0xff]  ;;  %v332_v32 = vld [vmem:[%s1254_s10 + $0x58] sm:$0xff]  ;;  %v325_v33 = vld [vmem:[%s1254_s10 + $0x20] sm:$0xff]  ;;  %v356_v43 = vadd.f32 %v340_v25, %v324_v24  ;;  %876 = vmatprep.subr.bf16.mxu0 %v995_v29  ;;  %897 = vmatprep.subr.bf16.mxu1 %v995_v29 }
  0x37   : > { %v369_v34 = vpack.c.bf16 %v354_v20, %v353_v19  ;;  %v326_v35 = vld [vmem:[%s1254_s10 + $0x28] sm:$0xff]  ;;  %v333_v37 = vld [vmem:[%s1254_s10 + $0x60] sm:$0xff]  ;;  %v363_v44 = vadd.f32 %v347_v26, %v331_v31  ;;  %v364_v45 = vadd.f32 %v348_v27, %v332_v32  ;;  %v357_v46 = vadd.f32 %v341_v28, %v325_v33  ;;  %v327_v50 = vld [vmem:[%s1254_s10 + $0x30] sm:$0xff] }
  0x38   : > { %v373_v38 = vpack.c.bf16 %v362_v30, %v361_v22  ;;  %v334_v39 = vld [vmem:[%s1254_s10 + $0x68] sm:$0xff]  ;;  %v358_v47 = vadd.f32 %v342_v36, %v326_v35  ;;  %v365_v48 = vadd.f32 %v349_v40, %v333_v37  ;;  %v328_v51 = vld [vmem:[%s1254_s10 + $0x38] sm:$0xff]  ;;  %v370_v52 = vpack.c.bf16 %v356_v43, %v355_v42  ;;  %v335_v56 = vld [vmem:[%s1254_s10 + $0x70] sm:$0xff] }
  0x39   : > { %878 = vmatprep.mubr.msk.bf16.mxu0 %vm409_vm0, %v369_v34  ;;  %v366_v49 = vadd.f32 %v350_v41, %v334_v39  ;;  %v374_v53 = vpack.c.bf16 %v364_v45, %v363_v44  ;;  %877 = vmatpush3.bf16.msra.mxu0 %v995_v29  ;;  %v336_v59 = vld [vmem:[%s1254_s10 + $0x78] sm:$0xff]  ;;  %v359_v62 = vadd.f32 %v343_v54, %v327_v50  ;;  %s300_s10 = sand.u32 1, %s1074_s13  }
  0x3a   : > { %886 = vmatprep.mubr.msk.bf16.mxu1 %vm409_vm0, %v373_v38  ;;  %901 = vmatpush3.bf16.msra.mxu1 %v995_v29  ;;  %v371_v57 = vpack.c.bf16 %v358_v47, %v357_v46  ;;  %v360_v63 = vadd.f32 %v344_v55, %v328_v51  ;;  %v367_v0 = vadd.f32 %v351_v60, %v335_v56  ;;  %s758_s4 = sshll.u32 %s300_s10, 6  ;;  %s1331_s5 = scalar_lea.sflag [#allocation4], %s300_s10 }
  0x3b   : > { %v375_v58 = vpack.c.bf16 %v366_v49, %v365_v48  ;;  %v368_v1 = vadd.f32 %v352_v61, %v336_v59  ;;  %s302_s15 = scalar_lea.vmem [#allocation3], %s758_s4  ;;  %s1000_s4 = sshll.u32 %s1108_s22, 4  ;;  %s1001_s4 = int_to_ptr.vmem [resolvable:$false] %s1000_s4 }
  0x3c   : > { %879 = vmatmul.mubr.msk.bf16.vlgmr.msra.gmra.mrb[0].mxu0 %vm409_vm0, %v370_v52  ;;  %v372_v2 = vpack.c.bf16 %v360_v63, %v359_v62  ;;  %s629_s29 = sshll.u32 %s302_s15, 4  ;;  %s1002_s26 = scalar_lea.vmem %s1001_s4, 2048  ;;  %s1327_s29 = int_to_ptr.vmem [resolvable:$true] %s629_s29 }
  0x3d   : > { %887 = vmatmul.mubr.msk.bf16.vlgmr.msra.gmra.mrb[0].mxu1 %vm409_vm0, %v374_v53  ;;  %882 = vmatprep.mubr.msk.bf16.mxu0 %vm409_vm0, %v371_v57  ;;  %v376_v3 = vpack.c.bf16 %v368_v1, %v367_v0  ;;  %s996_s11 = scalar_lea.vmem %s1327_s29, 1024  ;;  %p1003_p7 = scmp.lt.s32.totalorder %s1327_s29, %s1001_s4 }
  0x3e   : > { %890 = vmatprep.mubr.msk.bf16.mxu1 %vm409_vm0, %v375_v58  ;;  %p997_p4 = scmp.ne.s32.totalorder %s1327_s29, %s996_s11  ;;  %p1004_p8 = scmp.lt.s32.totalorder %s1002_s26, %s996_s11 }
  0x40   : > { %p998_p5 = pnand %p997_p4, %p1210_p10  ;;  %p1005_p9 = por %p1004_p8, %p1003_p7 }
  0x42   : > { %p999_p6 = pneg %p998_p5 }
  0x44   : > { %883 = vmatmul.mubr.msk.bf16.gmra.mrb[4].mxu0 %vm409_vm0, %v372_v2  ;;  %p1006_p11 = pnand %p1005_p9, %p999_p6 }
  0x45   : > { %891 = vmatmul.mubr.msk.bf16.gmra.mrb[4].mxu1 %vm409_vm0, %v376_v3 }
 0x10f   : > { %v880_v4 = vpop.f32.mrb[0].mxu0 }
 0x110   : > { %v888_v5 = vpop.f32.mrb[0].mxu1  ;;  %v468_v6 = vpop.f32.mrb[1].mxu0 }
 0x111   : > { %v500_v7 = vpop.f32.mrb[1].mxu1  ;;  %v881_v8 = vpop.f32.mrb[2].mxu0 }
 0x112   : > { %v889_v9 = vpop.f32.mrb[2].mxu1  ;;  %v819_v10 = vpack.c.bf16 %v881_v8, %v880_v4  ;;  %v471_v12 = vpop.f32.mrb[3].mxu0 }
 0x113   : > { %v839_v11 = vpack.c.bf16 %v889_v9, %v888_v5  ;;  %v503_v13 = vpop.f32.mrb[3].mxu1  ;;  %v814_v14 = vpack.c.bf16 %v471_v12, %v468_v6 }
 0x114   : > { %v834_v15 = vpack.c.bf16 %v503_v13, %v500_v7  ;;  %851 = vst [vmem:[%s302_s15 + $0x8] sm:$0xff] %v819_v10  }
 0x115   : > { %855 = vst [vmem:[%s302_s15 + $0x28] sm:$0xff] %v839_v11   ;;  %815 = vst [vmem:[%s302_s15] sm:$0xff] %v814_v14  }
 0x116   : > { %854 = vst [vmem:[%s302_s15 + $0x20] sm:$0xff] %v834_v15  }
 0x117   : > { %v884_v16 = vpop.f32.mrb[4].mxu0 }
 0x118   : > { %v892_v17 = vpop.f32.mrb[4].mxu1  ;;  %v484_v18 = vpop.f32.mrb[5].mxu0 }
 0x119   : > { %v516_v19 = vpop.f32.mrb[5].mxu1  ;;  %v885_v20 = vpop.f32.mrb[6].mxu0 }
 0x11a   : > { %v893_v21 = vpop.f32.mrb[6].mxu1  ;;  %v829_v22 = vpack.c.bf16 %v885_v20, %v884_v16  ;;  %v487_v24 = vpop.f32.mrb[7].mxu0 }
 0x11b   : > { %v849_v23 = vpack.c.bf16 %v893_v21, %v892_v17  ;;  %v519_v25 = vpop.f32.mrb[7].mxu1  ;;  %v824_v26 = vpack.c.bf16 %v487_v24, %v484_v18 }
 0x11c   : > { %v844_v27 = vpack.c.bf16 %v519_v25, %v516_v19  ;;  %853 = vst [vmem:[%s302_s15 + $0x18] sm:$0xff] %v829_v22  }
 0x11d   : > { %857 = vst [vmem:[%s302_s15 + $0x38] sm:$0xff] %v849_v23   ;;  %852 = vst [vmem:[%s302_s15 + $0x10] sm:$0xff] %v824_v26  }
 0x11e   : > { %856 = vst [vmem:[%s302_s15 + $0x30] sm:$0xff] %v844_v27  }
 0x11f   : > { %1009 = shalt.err (!%p1006_p11)
}
 0x120   : > { %s1010_s10 = scalar_lea.hbm %s1325_s9, 1024  ;;  %s1014_s27 = scalar_lea.hbm %s1392_s3, 6144 }
 0x121   : > { %p1011_p13 = scmp.ne.s32.totalorder %s1325_s9, %s1010_s10  ;;  %p1015_p2 = scmp.lt.u32.totalorder %s1325_s9, %s1392_s3 }
 0x122   : > { %p1016_p3 = scmp.lt.u32.totalorder %s1014_s27, %s1010_s10  ;;  %p1018_p5 = scmp.lt.u32.totalorder %s1010_s10, %s1325_s9 }
 0x123   : > { %p1012_p0 = pnand %p1011_p13, %p1210_p10 }
 0x124   : > { %p1017_p4 = por %p1016_p3, %p1015_p2 }
 0x125   : > { %p1013_p1 = pneg %p1012_p0 }
 0x126   : > { %p1019_p6 = por %p1018_p5, %p1017_p4 }
 0x128   : > { %p1020_p7 = pnand %p1019_p6, %p1013_p1 }
 0x12a   : > { %1023 = shalt.err (!%p1020_p7)
}
 0x12b   : > { %s1109_s18 = smov 64   ;;  %s1110_s11 = smov 4  }
 0x12c   : > { %903 = dma.vmem_to_hbm [thread:$0]  (%p1210_p10), %s1327_s29, 1024, %s1325_s9, %s1331_s5, %s1109_s18, %s1109_s18, %s1110_s11  }
 0x12d PF: > { %p909_p8 = scmp.ge.s32.totalorder %s1106_s21, 2  ;;  %s644_s22 = sand.u32 1, %s1070_s12  }
 0x12e   : > { %s645_s4 = scalar_lea.sflag [#allocation4], %s644_s22 }
 0x12f   : > { %p906_p9 = pnand %p909_p8, %p1217_p12 }
 0x131   : > { %1065 = dma.done.wait (!%p906_p9), %s645_s4, 1024  }
 0x132   : > { %1067 = vsyncadd (!%p906_p9), %s645_s4, 4294966272  ;;  %s16_s21 = sadd.s32 1, %s1106_s21   ;;  %s1396_s12 = smov %s1074_s13 }
 0x133   : > { %p13_p11 = scmp.ge.s32.totalorder %s16_s21, 8   ;;  %s1397_s13 = smov %s1078_s14 }
 0x134   : > { %s1398_s14 = smov %s1215_s7  ;;  %s1399_s15 = smov %s1086_s16 }
 0x135   : > { %s1400_s16 = smov %s1204_s30  ;;  %s1401_s17 = smov %s1098_s19 }
 0x136   : > { %s1402_s18 = smov %s1102_s20  ;;  %s1403_s19 = smov %s1406_s24 }
 0x137   : > { %s1404_s20 = smov %s1410_s25  ;;  %15 = sbr.rel (!%p13_p11) target bundleno = 6 (0x6), region = 119 }
 0x13e   :  { %650 = vsyncpa [#allocation4], 1 }
 0x13f   :  { %652 = vsyncpa [#allocation4 + $0x1], 1 }

</bundles_post_ra>
